<compile_context>
chip_gen: v7x
topology: tpu7x:2x2x1
jax: 0.10.0
libtpu: 0.0.40
codegen_flags: <defaults>
</compile_context>

<pallas_src>
import functools
import math

import numpy as np
import jax
import jax.numpy as jnp
from jax import lax
from jax.experimental import pallas as pl
from jax.experimental.pallas import tpu as pltpu


# ---------------------------------------------------------------------------
# Kernels
# ---------------------------------------------------------------------------

def _copy_kernel(x_ref, o_ref):
    # The roll lives entirely in the input index_map -> pure lane-dense copy.
    o_ref[...] = x_ref[...]


def _roll_lane_rotate_kernel(x_ref, o_ref, *, shift):
    # Fallback for lane-aligned widths: XLU rotate, no slice temporaries.
    o_ref[...] = pltpu.roll(x_ref[...], shift, 1)


def _roll_lane_slices_kernel(x_ref, o_ref, *, s, split):
    # Fallback for narrow / unaligned widths (m < 128 or m % 128 != 0):
    # two static sub-stores; guaranteed to lower for any width.
    x = x_ref[...]
    o_ref[:, :s] = x[:, split:]
    o_ref[:, s:] = x[:, :split]


# ---------------------------------------------------------------------------
# Helpers
# ---------------------------------------------------------------------------

def _tpu_vmem_bytes():
    try:
        return int(pltpu.get_tpu_info().vmem_capacity_bytes)
    except Exception:
        return 64 * 1024 * 1024            # conservative (v7x-sized) default


def _largest_aligned_divisor(n, align, limit):
    """Largest d with d | n, align | d, d <= limit (None if none exists)."""
    if n % align != 0:
        return None
    q = n // align
    limit_q = limit // align
    if limit_q < 1:
        return None
    best = None
    i = 1
    while i * i <= q:
        if q % i == 0:
            for d in (i, q // i):
                if d <= limit_q and (best is None or d > best):
                    best = d
        i += 1
    return None if best is None else best * align


# ---------------------------------------------------------------------------
# Wrapper
# ---------------------------------------------------------------------------

def roll_fftshift(x, axis=0):
    """Pallas TPU equivalent of the PyTorch `roll_fftshift` module."""
    ndim = x.ndim
    axis = axis % ndim
    dim = x.shape[axis]
    shift = dim // 2
    if shift == 0 or x.size == 0:          # nothing moves -> no kernel launch
        return x

    outer = math.prod(x.shape[:axis])
    inner = math.prod(x.shape[axis + 1:])
    m = dim * inner                        # flattened trailing extent
    s = shift * inner                      # roll amount in flattened units
    split = m - s                          # out[..., c] = x[..., (c + split) % m]
    g_cols = math.gcd(m, split)            # == inner * gcd(dim, shift)

    itemsize = x.dtype.itemsize
    pack = max(8, 32 // itemsize)          # sublane packing: 8 f32 / 16 bf16 / 32 i8
    vmem_cap = _tpu_vmem_bytes()
    vmem_budget = max(32 << 20, vmem_cap - (8 << 20))
    target = (8 << 20) if vmem_cap >= (128 << 20) else (4 << 20)

    # ---- Path B: small `outer` (e.g. the default axis=0). ------------------
    # Fold the trailing extent into (groups, W) rows; the roll becomes a
    # row-group permutation in the index_map -> sublane+lane dense pure copy,
    # multi-step pipelined, VMEM bounded for arbitrarily large arrays.
    if outer < pack and g_cols % (128 * 8) == 0:
        w_limit = max(128, min(g_cols // 8, target // max(1, outer * 8 * itemsize)))
        w = _largest_aligned_divisor(g_cols // 8, 128, w_limit)
        groups = m // w
        rho = split // w
        bc_limit = max(8, min(g_cols // w, target // max(1, outer * w * itemsize)))
        bc = _largest_aligned_divisor(g_cols // w, 8, bc_limit)
        n_blk = groups // bc               # exact (bc | groups), always >= 2
        rho_b = rho // bc                  # exact (bc | rho)
        block_bytes = outer * bc * w * itemsize
        vmem_limit = int(min(vmem_budget, max(4 << 20, 4 * block_bytes + (4 << 20))))

        x3 = x.reshape(outer, groups, w)
        out3 = pl.pallas_call(
            _copy_kernel,
            out_shape=jax.ShapeDtypeStruct((outer, groups, w), x.dtype),
            grid=(n_blk,),
            in_specs=[pl.BlockSpec((outer, bc, w),
                                   lambda c: (0, (c + rho_b) % n_blk, 0))],
            out_specs=pl.BlockSpec((outer, bc, w), lambda c: (0, c, 0)),
            compiler_params=pltpu.CompilerParams(
                dimension_semantics=("parallel",),
                vmem_limit_bytes=vmem_limit),
        )(x3)
        return out3.reshape(x.shape)

    # ---- Path A: lane-aligned roll expressed purely in the index_map. ------
    # 2-D (outer, m) view, column blocks TN | gcd(m, split) with TN % 128 == 0,
    # row blocks a multiple of the sublane packing.  Always >= 2 column steps.
    if m >= 128 and g_cols % 128 == 0:
        tn_limit = max(128, min(g_cols, target // max(1, pack * itemsize)))
        tn = _largest_aligned_divisor(g_cols, 128, tn_limit)
        n_col = m // tn                    # exact, >= 2
        off = split // tn                  # exact
        br_target = max(1, target // (tn * itemsize))
        if br_target >= outer:
            br = outer
        else:
            br = max(pack, (br_target // pack) * pack)
            if br >= outer:
                br = outer
        block_bytes = br * tn * itemsize
        vmem_limit = int(min(vmem_budget, max(4 << 20, 4 * block_bytes + (4 << 20))))

        x2 = x.reshape(outer, m)
        out2 = pl.pallas_call(
            _copy_kernel,
            out_shape=jax.ShapeDtypeStruct((outer, m), x.dtype),
            grid=(pl.cdiv(outer, br), n_col),
            in_specs=[pl.BlockSpec((br, tn),
                                   lambda r, c: (r, (c + off) % n_col))],
            out_specs=pl.BlockSpec((br, tn), lambda r, c: (r, c)),
            compiler_params=pltpu.CompilerParams(
                dimension_semantics=("parallel", "parallel"),
                vmem_limit_bytes=vmem_limit),
        )(x2)
        return out2.reshape(x.shape)

    # ---- Path C: in-kernel lane roll on full-width row blocks. -------------
    # Used for narrow or 128-unaligned trailing extents (e.g. a last-axis roll
    # with dim < 128).  Full-width blocks keep the output store as wide as the
    # shape allows; the shuffle uses the XLU rotate when lane-aligned.
    if outer <= pack:
        br = outer
    else:
        br_target = max(1, target // max(1, m * itemsize))
        br = max(pack, (br_target // pack) * pack)
        if br >= outer:
            br = outer
    block_bytes = br * m * itemsize
    if 6 * block_bytes + (4 << 20) <= vmem_budget:
        vmem_limit = int(min(vmem_budget, max(4 << 20, 6 * block_bytes + (4 << 20))))
        if m % 128 == 0:
            kernel = functools.partial(_roll_lane_rotate_kernel, shift=s)
        else:
            kernel = functools.partial(_roll_lane_slices_kernel, s=s, split=split)
        x2 = x.reshape(outer, m)
        out2 = pl.pallas_call(
            kernel,
            out_shape=jax.ShapeDtypeStruct((outer, m), x.dtype),
            grid=(pl.cdiv(outer, br),),
            in_specs=[pl.BlockSpec((br, m), lambda r: (r, 0))],
            out_specs=pl.BlockSpec((br, m), lambda r: (r, 0)),
            compiler_params=pltpu.CompilerParams(
                dimension_semantics=("parallel",),
                vmem_limit_bytes=vmem_limit),
        )(x2)
        return out2.reshape(x.shape)

    # ---- Last resort: gigantic, completely unaligned single rows. ----------
    # TODO(synk): cover this rare case (multi-MiB rows with a roll not divisible
    # by 128 and too few rows to block) with a manually double-buffered DMA kernel.
    before = lax.slice_in_dim(x, 0, dim - shift, axis=axis)
    after = lax.slice_in_dim(x, dim - shift, dim, axis=axis)
    return jnp.concatenate([after, before], axis=axis)


def _reference(x, axis):
    """Direct transcription of the PyTorch forward (narrow + cat)."""
    dim = x.shape[axis]
    shift = dim // 2
    before = lax.slice_in_dim(x, 0, dim - shift, axis=axis)
    after = lax.slice_in_dim(x, dim - shift, dim, axis=axis)
    return jnp.concatenate([after, before], axis=axis)


if __name__ == "__main__":
    key = jax.random.PRNGKey(0)
    x = jax.random.normal(key, (2, 4, 16, 16), dtype=jnp.float32)

    ok = True
    # axis=0 (module default) exercises Path B, axes 1/2 exercise Path A,
    # axis=3 (narrow trailing dim) exercises Path C.
    for axis in range(x.ndim):
        out = jax.block_until_ready(roll_fftshift(x, axis=axis))
        ref = jax.block_until_ready(_reference(x, axis))
        if not np.array_equal(np.asarray(out), np.asarray(ref)):
            ok = False
            print(f"mismatch on axis={axis}")

    if not ok:
        raise AssertionError("Pallas roll_fftshift does not match reference")
    print("KERNEL_OK")
</pallas_src>

<mosaic_0001>
module attributes {stable_mosaic.version = 11 : i64} {
  func.func @_copy_kernel(%arg0: i32, %arg1: memref<1x8x128xf32, #tpu.memory_space<vmem>>, %arg2: memref<1x8x128xf32, #tpu.memory_space<vmem>>) attributes {dimension_semantics = [#tpu.dimension_semantics<parallel>], iteration_bounds = array<i64: 2>, scalar_prefetch = 0 : i64, scratch_operands = 0 : i64, tpu.core_type = #tpu.core_type<tc>, window_params = [{transform_indices = @transform_0, window_bounds = array<i64: 1, 8, 128>}, {transform_indices = @transform_1, window_bounds = array<i64: 1, 8, 128>}]} {
    %c0 = arith.constant 0 : index
    %c0_0 = arith.constant 0 : index
    %c0_1 = arith.constant 0 : index
    %0 = vector.load %arg1[%c0, %c0_0, %c0_1] : memref<1x8x128xf32, #tpu.memory_space<vmem>>, vector<1x8x128xf32>
    %c0_2 = arith.constant 0 : index
    %c0_3 = arith.constant 0 : index
    %c0_4 = arith.constant 0 : index
    %1 = vector.load %arg2[%c0_2, %c0_3, %c0_4] : memref<1x8x128xf32, #tpu.memory_space<vmem>>, vector<1x8x128xf32>
    tpu.vector_store %arg2[%c0_2, %c0_3, %c0_4], %0 {strides = array<i32>} : memref<1x8x128xf32, #tpu.memory_space<vmem>>, vector<1x8x128xf32>,
    return
  }
  func.func @transform_0(%arg0: i32) -> (i32, i32, i32) {
    %c1_i32 = arith.constant 1 : i32
    %0 = arith.addi %arg0, %c1_i32 : i32
    %c2_i32 = arith.constant 2 : i32
    %c0_i32 = arith.constant 0 : i32
    %1 = arith.cmpi eq, %c2_i32, %c0_i32 : i32
    %c1_i32_0 = arith.constant 1 : i32
    %2 = arith.select %1, %c1_i32_0, %c2_i32 : i32
    %3 = arith.remsi %0, %2 : i32
    %c0_i32_1 = arith.constant 0 : i32
    %4 = arith.cmpi ne, %3, %c0_i32_1 : i32
    %c0_i32_2 = arith.constant 0 : i32
    %5 = arith.cmpi slt, %3, %c0_i32_2 : i32
    %c0_i32_3 = arith.constant 0 : i32
    %6 = arith.cmpi slt, %2, %c0_i32_3 : i32
    %7 = arith.xori %5, %6 : i1
    %8 = arith.andi %7, %4 : i1
    %9 = arith.addi %3, %2 : i32
    %10 = arith.select %8, %9, %3 : i32
    %c0_i32_4 = arith.constant 0 : i32
    %c0_i32_5 = arith.constant 0 : i32
    %c0_i32_6 = arith.constant 0 : i32
    return %c0_i32_4, %10, %c0_i32_5 : i32, i32, i32
  }
  func.func @transform_1(%arg0: i32) -> (i32, i32, i32) {
    %c0_i32 = arith.constant 0 : i32
    %c0_i32_0 = arith.constant 0 : i32
    %c0_i32_1 = arith.constant 0 : i32
    return %c0_i32, %arg0, %c0_i32_0 : i32, i32, i32
  }
}

</mosaic_0001>

<bundles_post_ra>
// kernel: tpu_custom_call.1
= control target key start
LH: loop header
LB: loop body
LE: loop exit
PB: predicated region body
PF: predicated region fallthrough
CT: control target
= control target key end

     0   :  { %6 = vsyncpa [#allocation3], 0  ;;  %s696_s0 = inlined_call_operand.hbm [shape: f32[1,16,128], index: 0, kind: input, shape index: {}]   ;;  %s697_s1 = inlined_call_operand.hbm [shape: f32[1,16,128], index: 1, kind: output, shape index: {}]  }
   0x1   :  { %8 = vsyncpa [#allocation3 + $0x1], 0 }
   0x2   :  { %9 = vsyncpa [#allocation4], 0 }
   0x3   :  { %11 = vsyncpa [#allocation4 + $0x1], 0  ;;  %s495_s6 = smov 0   ;;  %s497_s7 = smov 0  }
   0x4   :  { %s499_s8 = smov 0   ;;  %s501_s9 = smov 0  }
   0x5   :  { %s503_s10 = smov 0   ;;  %s505_s11 = smov 0  }
   0x6   :  { %s507_s12 = smov 0  }
   0x7 LB: > { %s531_s13 = sadd.s32 4294967295, %s481_s12   ;;  %s270_s14 = sadd.s32 4294967294, %s481_s12   ;;  %s481_s12 = sphi %s507_s12, %s715_s12   ;;  %s477_s11 = sphi %s505_s11, %s714_s11   ;;  %s473_s10 = sphi %s503_s10, %s713_s10   ;;  %s469_s9 = sphi %s501_s9, %s712_s9   ;;  %s465_s8 = sphi %s499_s8, %s711_s8   ;;  %s461_s7 = sphi %s497_s7, %s710_s7   ;;  %s457_s6 = sphi %s495_s6, %s709_s6  }
   0x8   : > { %s535_s15 = sadd.s32 1, %s481_s12   ;;  %s50_s16 = sadd.s32 1, %s477_s11 }
   0x9   : > { %p22_p0 = scmp.lt.s32.totalorder %s535_s15, 0  ;;  %s23_s17 = ssub.s32 0, %s535_s15 }
   0xa   : > { %s271_s18 = smin.u32 %s23_s17, %s535_s15  ;;  %s34_s19 = sadd.s32 1, %s535_s15 }
   0xb   : > { %s25_s20 = sand.u32 1, %s271_s18   ;;  %p35_p1 = scmp.lt.s32.totalorder %s34_s19, 0 }
   0xc   : > { %s26_s21 = ssub.s32 0, %s25_s20  ;;  %s36_s22 = ssub.s32 0, %s34_s19 }
   0xd   : > { %s717_s21 = smov (!%p22_p0, %s26_s21), %s25_s20  ;;  %s274_s23 = smin.u32 %s36_s22, %s34_s19 }
   0xe   : > { %p57_p2 = scmp.ne.s32.totalorder %s477_s11, %s473_s10  ;;  %p273_p3 = scmp.lt.s32.totalorder %s717_s21, 0 }
   0xf   : > { %s32_s24 = sadd.s32 2, %s717_s21  ;;  %s38_s25 = sand.u32 1, %s274_s23  }
  0x10   : > { %p58_p4 = scmp.eq.s32.totalorder %s481_s12, 0  ;;  %s719_s24 = smov (!%p273_p3, %s32_s24), %s717_s21 }
  0x11   : > { %s39_s26 = ssub.s32 0, %s38_s25  ;;  %p63_p6 = scmp.ne.s32.totalorder %s473_s10, %s469_s9 }
  0x12   : > { %p547_p5 = por %p58_p4, %p57_p2  ;;  %s721_s26 = smov (!%p35_p1, %s39_s26), %s38_s25 }
  0x13   : > { %p64_p7 = scmp.eq.s32.totalorder %s531_s13, 0  ;;  %p276_p8 = scmp.lt.s32.totalorder %s721_s26, 0 }
  0x14   : > { %s45_s28 = sadd.s32 2, %s721_s26  ;;  %s73_s30 = ssub.s32 %s481_s12, %s535_s15 }
  0x15   : > { %p555_p9 = por %p64_p7, %p63_p6  ;;  %s723_s28 = smov (!%p276_p8, %s45_s28), %s721_s26 }
  0x16   : > { %p74_p10 = scmp.eq.s32.totalorder %s73_s30, 0  ;;  %s76_s2 = sadd.s32 1, %s465_s8 }
  0x17   : > { %s47_s3 = ssub.s32 %s719_s24, %s723_s28  ;;  %p86_p11 = scmp.ne.s32.totalorder %s465_s8, %s461_s7 }
  0x18   : > { %p48_p12 = scmp.eq.s32.totalorder %s47_s3, 0  ;;  %p87_p13 = scmp.eq.s32.totalorder %s531_s13, 1 }
  0x19   : > { %s567_s4 = scalar_select %p74_p10, %s465_s8, %s76_s2  }
  0x1a   : > { %s572_s5 = scalar_select %p48_p12, %s477_s11, %s50_s16  }
  0x1b   : > { %p574_p0 = por %p87_p13, %p86_p11  ;;  %p92_p1 = scmp.ne.s32.totalorder %s461_s7, %s457_s6 }
  0x1c   : > { %p93_p2 = scmp.eq.s32.totalorder %s270_s14, 1  ;;  %p303_p4 = scmp.lt.s32.totalorder %s481_s12, 2 }
  0x1d   : > { %s701_s9 = scalar_select %p574_p0, 1, 0 }
  0x1e   : > { %s113_s17 = sand.u32 1, %s477_s11   ;;  %p585_p6 = por %p93_p2, %p92_p1 }
  0x1f   : > { %s279_s19 = sshll.u32 %s113_s17, 3  ;;  %s283_s20 = sshll.u32 %s719_s24, 7 }
  0x20   : > { %s702_s18 = scalar_select %p585_p6, 1, 0 }
  0x21   : > { %s593_s22 = scalar_lea.hbm %s696_s0, %s283_s20  ;;  %s117_s23 = scalar_lea.vmem [#allocation2], %s279_s19 }
  0x22   : > { %s137_s14 = sshll.u32 %s117_s23, 4  ;;  %p597_p7 = pnand %p303_p4, %p547_p5  ;;  %s601_s14 = int_to_ptr.vmem [resolvable:$true] %s137_s14 }
  0x23   : > { %s114_s24 = scalar_lea.sflag [#allocation3], %s113_s17  ;;  %s361_s26 = scalar_lea.hbm %s593_s22, 128 }
  0x24   : > { %p362_p11 = scmp.ne.s32.totalorder %s593_s22, %s361_s26  ;;  %p363_p12 = pneg %p597_p7 }
  0x25   : > { %s366_s30 = scalar_lea.hbm %s696_s0, 256  ;;  %p367_p5 = scmp.lt.u32.totalorder %s593_s22, %s696_s0 }
  0x26   : > { %p364_p13 = pnand %p363_p12, %p362_p11  ;;  %p368_p2 = scmp.lt.u32.totalorder %s366_s30, %s361_s26 }
  0x27   : > { %p370_p3 = scmp.lt.u32.totalorder %s361_s26, %s593_s22 }
  0x28   : > { %p365_p1 = pneg %p364_p13  ;;  %p369_p4 = por %p368_p2, %p367_p5 }
  0x2a   : > { %p371_p8 = por %p370_p3, %p369_p4 }
  0x2c   : > { %p372_p10 = pnand %p371_p8, %p365_p1 }
  0x2e   : > { %375 = shalt.err (!%p372_p10)
}
  0x2f   : > { %s376_s17 = scalar_lea.vmem %s601_s14, 128  ;;  %s483_s19 = smov [#allocation2]  }
  0x30   : > { %p377_p11 = scmp.ne.s32.totalorder %s601_s14, %s376_s17  ;;  %s381_s20 = sshll.u32 %s483_s19, 4  ;;  %s382_s20 = int_to_ptr.vmem [resolvable:$false] %s381_s20 }
  0x31   : > { %s383_s21 = scalar_lea.vmem %s382_s20, 256  ;;  %p384_p0 = scmp.lt.s32.totalorder %s601_s14, %s382_s20 }
  0x32   : > { %p379_p13 = pnand %p377_p11, %p363_p12  ;;  %p385_p5 = scmp.lt.s32.totalorder %s383_s21, %s376_s17 }
  0x34   : > { %p380_p6 = pneg %p379_p13  ;;  %p386_p2 = por %p385_p5, %p384_p0 }
  0x36   : > { %p387_p3 = pnand %p386_p2, %p380_p6 }
  0x38   : > { %390 = shalt.err (!%p387_p3)
}
  0x39   : > { %298 = dma.hbm_to_vmem [thread:$0]  (!%p597_p7), %s593_s22, 128, %s601_s14, %s114_s24  }
  0x3a   : > { %p704_p8 = scmp.lt.s32.totalorder %s481_s12, 3  ;;  %p705_p10 = scmp.ge.s32.totalorder %s481_s12, 1 }
  0x3c   : > { %p143_p12 = pnand %p705_p10, %p704_p8 }
  0x3d   : > { %s148_s16 = sand.u32 (!%p143_p12), 1, %s473_s10  }
  0x3e   : > { %146 = sbr.rel (%p143_p12) target bundleno = 96 (0x60), region = 24  ;;  %s285_s23 = sshll.u32 (!%p143_p12), %s148_s16, 3 }
  0x3f   : > { %s149_s26 = scalar_lea.sflag (!%p143_p12), [#allocation3], %s148_s16  ;;  %s152_s27 = scalar_lea.vmem (!%p143_p12), [#allocation2], %s285_s23 }
  0x45   : > { %448 = dma.done.wait (%p555_p9), %s149_s26, 128  }
  0x46   : > { %450 = vsyncadd (%p555_p9), %s149_s26, 4294967168  ;;  %s168_s25 = sand.u32 1, %s461_s7   ;;  %s288_s28 = sshll.u32 %s531_s13, 7  ;;  %v184_v0 = vld [vmem:[%s152_s27] sm:$0xff] }
  0x47   : > { %s286_s22 = sshll.u32 %s168_s25, 3  ;;  %s646_s3 = scalar_lea.hbm %s697_s1, %s288_s28 }
  0x48   : > { %s170_s14 = scalar_lea.vmem [#allocation5], %s286_s22  ;;  %s187_s29 = scalar_lea.sflag [#allocation4], %s168_s25 }
  0x49   : > { %s200_s24 = sshll.u32 %s170_s14, 4  ;;  %185 = vst [vmem:[%s170_s14] sm:$0xff] %v184_v0  ;;  %p706_p0 = scmp.ne.s32.totalorder %s701_s9, 0  ;;  %s641_s24 = int_to_ptr.vmem [resolvable:$true] %s200_s24 }
  0x4a   : > { %s391_s17 = scalar_lea.vmem %s641_s24, 128  ;;  %s484_s19 = smov [#allocation5]  }
  0x4b   : > { %p392_p9 = scmp.ne.s32.totalorder %s641_s24, %s391_s17  ;;  %s395_s13 = sshll.u32 %s484_s19, 4  ;;  %s396_s13 = int_to_ptr.vmem [resolvable:$false] %s395_s13 }
  0x4c   : > { %s397_s20 = scalar_lea.vmem %s396_s13, 256  ;;  %p398_p1 = scmp.lt.s32.totalorder %s641_s24, %s396_s13 }
  0x4d   : > { %p393_p6 = pnand %p392_p9, %p706_p0  ;;  %p399_p4 = scmp.lt.s32.totalorder %s397_s20, %s391_s17 }
  0x4f   : > { %p394_p7 = pneg %p393_p6  ;;  %p400_p11 = por %p399_p4, %p398_p1 }
  0x51   : > { %p401_p13 = pnand %p400_p11, %p394_p7 }
  0x53   : > { %404 = shalt.err (!%p401_p13)
}
  0x54   : > { %s405_s21 = scalar_lea.hbm %s646_s3, 128  ;;  %s409_s26 = scalar_lea.hbm %s697_s1, 256 }
  0x55   : > { %p406_p5 = scmp.ne.s32.totalorder %s646_s3, %s405_s21  ;;  %p410_p8 = scmp.lt.u32.totalorder %s646_s3, %s697_s1 }
  0x56   : > { %p411_p10 = scmp.lt.u32.totalorder %s409_s26, %s405_s21  ;;  %p413_p9 = scmp.lt.u32.totalorder %s405_s21, %s646_s3 }
  0x57   : > { %p407_p2 = pnand %p406_p5, %p706_p0 }
  0x58   : > { %p412_p12 = por %p411_p10, %p410_p8 }
  0x59   : > { %p408_p3 = pneg %p407_p2 }
  0x5a   : > { %p414_p6 = por %p413_p9, %p412_p12 }
  0x5c   : > { %p415_p7 = pnand %p414_p6, %p408_p3 }
  0x5e   : > { %418 = shalt.err (!%p415_p7)
}
  0x5f   : > { %293 = dma.vmem_to_hbm [thread:$0]  (%p706_p0), %s641_s24, 128, %s646_s3, %s187_s29  }
  0x60 PF: > { %s212_s22 = sand.u32 1, %s457_s6   ;;  %p707_p1 = scmp.ne.s32.totalorder %s702_s18, 0 }
  0x61   : > { %p708_p4 = scmp.ge.s32.totalorder %s481_s12, 2  ;;  %s213_s14 = scalar_lea.sflag [#allocation4], %s212_s22 }
  0x63   : > { %p300_p11 = pnand %p708_p4, %p707_p1 }
  0x65   : > { %452 = dma.done.wait (!%p300_p11), %s213_s14, 128  }
  0x66   : > { %454 = vsyncadd (!%p300_p11), %s213_s14, 4294967168  ;;  %p14_p0 = scmp.ge.s32.totalorder %s535_s15, 4   ;;  %s709_s6 = smov %s461_s7 }
  0x67   : > { %s710_s7 = smov %s465_s8  ;;  %s711_s8 = smov %s567_s4 }
  0x68   : > { %s712_s9 = smov %s473_s10  ;;  %s713_s10 = smov %s477_s11 }
  0x69   : > { %s714_s11 = smov %s572_s5  ;;  %s715_s12 = smov %s535_s15 }
  0x6a   :  { %16 = sbr.rel (!%p14_p0) target bundleno = 7 (0x7), region = 69 }
  0x71   :  { %218 = vsyncpa [#allocation3], 1 }
  0x72   :  { %220 = vsyncpa [#allocation3 + $0x1], 1 }
  0x73   :  { %221 = vsyncpa [#allocation4], 1 }
  0x74   :  { %223 = vsyncpa [#allocation4 + $0x1], 1 }

</bundles_post_ra>
